<compile_context>
chip_gen: v7x
topology: tpu7x:2x2x1
jax: 0.10.0
libtpu: 0.0.40
codegen_flags: <defaults>
</compile_context>

<pallas_src>
import jax
import jax.numpy as jnp
from jax.experimental import pallas as pl
from jax.experimental.pallas import tpu as pltpu


def _ce_partial_kernel(logits_ref, label_ref, out_ref):
    # (TB, C) tile; all math in f32.
    x = logits_ref[...].astype(jnp.float32)
    y = label_ref[...].astype(jnp.float32)

    # Numerically stable log-sum-exp over the class (lane) axis == dim=1.
    m = jnp.max(x, axis=-1, keepdims=True)                               # (TB, 1)
    shifted = x - m                                                      # (TB, C)
    lse = jnp.log(jnp.sum(jnp.exp(shifted), axis=-1, keepdims=True))     # (TB, 1)

    sum_y = jnp.sum(y, axis=-1, keepdims=True)                           # (TB, 1)

    # sum over rows of [-sum_c y*(shifted - lse)]
    #   == sum(lse * sum_y) - sum(y * shifted)        (logprobs never formed)
    partial = jnp.sum(lse * sum_y) - jnp.sum(y * shifted)                # ()

    # Lane-dense (8, 128) write of this tile's partial (unmasked vst); the
    # wrapper only reads element [0, 0] of each block.
    out_ref[...] = jnp.broadcast_to(partial, out_ref.shape)


def _pick_tile_b(n, c, in_itemsize):
    """Largest batch tile that fits the VMEM budget, rounded to sublane packing."""
    pack = 16 if in_itemsize < 4 else 8  # bf16 rows pack 16/vreg, f32 pack 8/vreg
    # Budget: 2 inputs x 2 pipeline buffers (input dtype) + ~3 f32 tile temps.
    # Keep below every generation's default scoped VMEM limit (16 MiB on v5e,
    # 32 MiB on v6e/v7x) with headroom.
    budget_bytes = 12 * 1024 * 1024
    bytes_per_row = c * (4 * in_itemsize + 3 * 4)
    tile_b = budget_bytes // max(bytes_per_row, 1)
    tile_b = min(int(tile_b), 1024)
    tile_b = max(pack, (tile_b // pack) * pack)
    # Never bigger than the (packing-rounded) batch itself.
    n_round = ((n + pack - 1) // pack) * pack
    return min(tile_b, n_round)


def softmax_with_cross_entropy(logits, label, *, tile_b=None):
    """mean_b[ -sum_c label[b, c] * log_softmax(logits, axis=1)[b, c] ]."""
    N, C = logits.shape
    assert label.shape == (N, C)

    in_itemsize = max(jnp.dtype(logits.dtype).itemsize,
                      jnp.dtype(label.dtype).itemsize)
    pack = 16 if in_itemsize < 4 else 8
    if tile_b is None:
        tile_b = _pick_tile_b(N, C, in_itemsize)
    assert tile_b % pack == 0, "tile_b must respect sublane packing (8 f32 / 16 bf16)"

    # Pad the batch up to a multiple of tile_b with zero rows.  A zero label
    # row contributes exactly 0 to the summed loss (lse * 0 - 0), so padding is
    # loss-neutral; we divide by the true N at the end.
    num_tiles = pl.cdiv(N, tile_b)
    n_pad = num_tiles * tile_b
    if n_pad != N:
        pad = ((0, n_pad - N), (0, 0))
        logits = jnp.pad(logits, pad)
        label = jnp.pad(label, pad)

    partials = pl.pallas_call(
        _ce_partial_kernel,
        out_shape=jax.ShapeDtypeStruct((num_tiles * 8, 128), jnp.float32),
        grid_spec=pltpu.PrefetchScalarGridSpec(
            num_scalar_prefetch=0,
            grid=(num_tiles,),
            in_specs=[
                pl.BlockSpec((tile_b, C), lambda i: (i, 0)),
                pl.BlockSpec((tile_b, C), lambda i: (i, 0)),
            ],
            # Each grid step owns a distinct (8, 128) output block -> the batch
            # tile axis is a true 'parallel' axis (sharded across both TCs on
            # v7x), instead of a serial resident-scalar accumulation.
            out_specs=pl.BlockSpec((8, 128), lambda i: (i, 0)),
        ),
        compiler_params=pltpu.CompilerParams(
            dimension_semantics=("parallel",),
        ),
    )(logits, label)

    # Tiny final reduction (num_tiles scalars) + mean over the TRUE batch size.
    per_tile = partials[0::8, 0]
    return jnp.sum(per_tile) / jnp.float32(N)


if __name__ == "__main__":
    key = jax.random.PRNGKey(0)
    k1, k2, k3, k4 = jax.random.split(key, 4)

    def _ref(lg, lb):
        return jnp.mean(
            -jnp.sum(lb * jax.nn.log_softmax(lg.astype(jnp.float32), axis=1), axis=1)
        )

    # Case 1: small shapes consistent with the module (batch=16, classes=32).
    N, C = 16, 32
    logits = jax.random.normal(k1, (N, C), dtype=jnp.float32)
    label = jax.nn.softmax(jax.random.normal(k2, (N, C), dtype=jnp.float32), axis=1)
    loss = jax.block_until_ready(softmax_with_cross_entropy(logits, label))
    assert jnp.allclose(loss, _ref(logits, label), rtol=1e-5, atol=1e-5), (
        loss, _ref(logits, label))

    # Case 2: batch not a multiple of the tile / packing (exercises zero-row padding).
    N2, C2 = 10, 40
    logits2 = jax.random.normal(k3, (N2, C2), dtype=jnp.float32)
    label2 = jax.nn.softmax(jax.random.normal(k4, (N2, C2), dtype=jnp.float32), axis=1)
    loss2 = jax.block_until_ready(softmax_with_cross_entropy(logits2, label2))
    assert jnp.allclose(loss2, _ref(logits2, label2), rtol=1e-5, atol=1e-5), (
        loss2, _ref(logits2, label2))

    print("KERNEL_OK")
</pallas_src>

<mosaic_0001>
module attributes {stable_mosaic.version = 11 : i64} {
  func.func @_ce_partial_kernel(%arg0: i32, %arg1: memref<16x32xf32, #tpu.memory_space<vmem>>, %arg2: memref<16x32xf32, #tpu.memory_space<vmem>>, %arg3: memref<8x128xf32, #tpu.memory_space<vmem>>) attributes {dimension_semantics = [#tpu.dimension_semantics<parallel>], iteration_bounds = array<i64: 1>, scalar_prefetch = 0 : i64, scratch_operands = 0 : i64, tpu.core_type = #tpu.core_type<tc>, window_params = [{transform_indices = @transform_0, window_bounds = array<i64: 16, 32>}, {transform_indices = @transform_1, window_bounds = array<i64: 16, 32>}, {transform_indices = @transform_2, window_bounds = array<i64: 8, 128>}]} {
    %c0 = arith.constant 0 : index
    %c0_0 = arith.constant 0 : index
    %0 = vector.load %arg1[%c0, %c0_0] : memref<16x32xf32, #tpu.memory_space<vmem>>, vector<16x32xf32>
    %c0_1 = arith.constant 0 : index
    %c0_2 = arith.constant 0 : index
    %1 = vector.load %arg2[%c0_1, %c0_2] : memref<16x32xf32, #tpu.memory_space<vmem>>, vector<16x32xf32>
    %cst = arith.constant dense<0xFF800000> : vector<16xf32>
    %2 = vector.multi_reduction <maximumf>, %0, %cst [1] : vector<16x32xf32> to vector<16xf32>
    %3 = vector.shape_cast %2 : vector<16xf32> to vector<16x1xf32>
    %4 = vector.broadcast %3 : vector<16x1xf32> to vector<16x32xf32>
    %5 = arith.subf %0, %4 : vector<16x32xf32>
    %6 = math.exp %5 : vector<16x32xf32>
    %cst_3 = arith.constant dense<0.000000e+00> : vector<16xf32>
    %7 = vector.multi_reduction <add>, %6, %cst_3 [1] : vector<16x32xf32> to vector<16xf32>
    %8 = vector.shape_cast %7 : vector<16xf32> to vector<16x1xf32>
    %9 = math.log %8 : vector<16x1xf32>
    %cst_4 = arith.constant dense<0.000000e+00> : vector<16xf32>
    %10 = vector.multi_reduction <add>, %1, %cst_4 [1] : vector<16x32xf32> to vector<16xf32>
    %11 = vector.shape_cast %10 : vector<16xf32> to vector<16x1xf32>
    %12 = arith.mulf %9, %11 : vector<16x1xf32>
    %13 = vector.shape_cast %12 : vector<16x1xf32> to vector<1x16x1xf32>
    %cst_5 = arith.constant dense<0.000000e+00> : vector<1xf32>
    %14 = vector.multi_reduction <add>, %13, %cst_5 [1, 2] : vector<1x16x1xf32> to vector<1xf32>
    %15 = vector.shape_cast %14 : vector<1xf32> to vector<1x1x1xf32>
    %16 = vector.extract %15[0, 0, 0] : f32 from vector<1x1x1xf32>
    %17 = arith.mulf %1, %5 : vector<16x32xf32>
    %18 = vector.shape_cast %17 : vector<16x32xf32> to vector<1x16x32xf32>
    %cst_6 = arith.constant dense<0.000000e+00> : vector<1xf32>
    %19 = vector.multi_reduction <add>, %18, %cst_6 [1, 2] : vector<1x16x32xf32> to vector<1xf32>
    %20 = vector.shape_cast %19 : vector<1xf32> to vector<1x1x1xf32>
    %21 = vector.extract %20[0, 0, 0] : f32 from vector<1x1x1xf32>
    %22 = arith.subf %16, %21 : f32
    %23 = vector.broadcast %22 : f32 to vector<8x128xf32>
    %c0_7 = arith.constant 0 : index
    %c0_8 = arith.constant 0 : index
    %24 = vector.load %arg3[%c0_7, %c0_8] : memref<8x128xf32, #tpu.memory_space<vmem>>, vector<8x128xf32>
    tpu.vector_store %arg3[%c0_7, %c0_8], %23 {strides = array<i32>} : memref<8x128xf32, #tpu.memory_space<vmem>>, vector<8x128xf32>,
    return
  }
  func.func @transform_0(%arg0: i32) -> (i32, i32) {
    %c0_i32 = arith.constant 0 : i32
    %c0_i32_0 = arith.constant 0 : i32
    return %arg0, %c0_i32 : i32, i32
  }
  func.func @transform_1(%arg0: i32) -> (i32, i32) {
    %c0_i32 = arith.constant 0 : i32
    %c0_i32_0 = arith.constant 0 : i32
    return %arg0, %c0_i32 : i32, i32
  }
  func.func @transform_2(%arg0: i32) -> (i32, i32) {
    %c0_i32 = arith.constant 0 : i32
    %c0_i32_0 = arith.constant 0 : i32
    return %arg0, %c0_i32 : i32, i32
  }
}

</mosaic_0001>

<bundles_post_ra>
// kernel: tpu_custom_call.1
= control target key start
LH: loop header
LB: loop body
LE: loop exit
PB: predicated region body
PF: predicated region fallthrough
CT: control target
= control target key end

     0   :  { %7 = vsyncpa [#allocation3], 0  ;;  %s274_s0 = inlined_call_operand.hbm [shape: f32[16,32], index: 0, kind: input, shape index: {}]   ;;  %s275_s1 = inlined_call_operand.hbm [shape: f32[16,32], index: 1, kind: input, shape index: {}]   ;;  %s276_s2 = inlined_call_operand.hbm [shape: f32[8,128], index: 2, kind: output, shape index: {}]  }
   0x1   :  { %8 = vsyncpa [#allocation6], 0 }
   0x2   :  { %9 = vsyncpa [#allocation4], 0  ;;  %s210_s9 = smov [#allocation2]   ;;  %s138_s13 = scalar_lea.hbm %s274_s0, 256 }
   0x3   :  { %s15_s10 = sshll.u32 %s210_s9, 4  ;;  %p139_p0 = scmp.ne.s32.totalorder %s274_s0, %s138_s13  ;;  %s16_s10 = int_to_ptr.vmem [resolvable:$true] %s15_s10 }
   0x4   :  { %p142_p1 = scmp.lt.u32.totalorder %s138_s13, %s274_s0 }
   0x6   :  { %p144_p2 = pnand %p142_p1, %p139_p0 }
   0x8   :  { %147 = shalt.err (!%p144_p2)
}
   0x9   :  { %s148_s18 = scalar_lea.vmem %s16_s10, 256  ;;  %p153_p4 = scmp.lt.s32.totalorder %s16_s10, %s16_s10 }
   0xa   :  { %p149_p3 = scmp.ne.s32.totalorder %s16_s10, %s148_s18  ;;  %p154_p5 = scmp.lt.s32.totalorder %s148_s18, %s148_s18 }
   0xc   :  { %p155_p6 = por %p154_p5, %p153_p4 }
   0xe   :  { %p156_p7 = pnand %p155_p6, %p149_p3 }
  0x10   :  { %159 = shalt.err (!%p156_p7)
}
  0x11   :  { %s211_s19 = smov 128   ;;  %s212_s20 = smov 8  }
  0x12   :  { %21 = dma.hbm_to_vmem [thread:$0]  %s274_s0, 256, %s16_s10, [#allocation3], %s211_s19, %s211_s19, %s212_s20  }
  0x13   :  { %s213_s23 = smov [#allocation5]   ;;  %s160_s27 = scalar_lea.hbm %s275_s1, 256 }
  0x14   :  { %s27_s24 = sshll.u32 %s213_s23, 4  ;;  %p161_p8 = scmp.ne.s32.totalorder %s275_s1, %s160_s27  ;;  %s28_s24 = int_to_ptr.vmem [resolvable:$true] %s27_s24 }
  0x15   :  { %p164_p9 = scmp.lt.u32.totalorder %s160_s27, %s275_s1 }
  0x17   :  { %p166_p10 = pnand %p164_p9, %p161_p8 }
  0x19   :  { %169 = shalt.err (!%p166_p10)
}
  0x1a   :  { %s170_s4 = scalar_lea.vmem %s28_s24, 256  ;;  %p175_p12 = scmp.lt.s32.totalorder %s28_s24, %s28_s24 }
  0x1b   :  { %p171_p11 = scmp.ne.s32.totalorder %s28_s24, %s170_s4  ;;  %p176_p13 = scmp.lt.s32.totalorder %s170_s4, %s170_s4 }
  0x1d   :  { %p177_p0 = por %p176_p13, %p175_p12 }
  0x1f   :  { %p178_p1 = pnand %p177_p0, %p171_p11 }
  0x21   :  { %181 = shalt.err (!%p178_p1)
}
  0x22   :  { %33 = dma.hbm_to_vmem [thread:$0]  %s275_s1, 256, %s28_s24, [#allocation6], %s211_s19, %s211_s19, %s212_s20  }
  0x23   :  { %204 = dma.done.wait [#allocation3], 256  }
  0x24   :  { %205 = vsyncadd [#allocation3], 4294967040 }
  0x25   :  { %206 = dma.done.wait [#allocation6], 256  }
  0x26   :  { %207 = vsyncadd [#allocation6], 4294967040  ;;  %vm44_vm0 = vcmask 261120   ;;  %v40_v0 = vld [vmem:[#allocation2] sm:$0xff]  ;;  %v41_v1 = vld [vmem:[#allocation2 + $0x8] sm:$0xff]  ;;  %vm75_vm1 = vcmask 7168  }
  0x27   :  { %v45_v2 = vsel %vm44_vm0, %v40_v0, -inf  ;;  %v48_v3 = vsel %vm44_vm0, %v41_v1, -inf  ;;  %v42_v4 = vld [vmem:[#allocation5] sm:$0xff]  ;;  %v43_v14 = vld [vmem:[#allocation5 + $0x8] sm:$0xff]  ;;  %s214_s6 = smov [#allocation7]  }
  0x28   :  { %46 = vmax.xlane.f32.xlu0 %v45_v2  ;;  %v67_v5 = vsel %vm44_vm0, %v42_v4, 0.0  ;;  %v70_v19 = vsel %vm44_vm0, %v43_v14, 0.0  ;;  %s111_s7 = sshll.u32 %s214_s6, 4  ;;  %s112_s7 = int_to_ptr.vmem [resolvable:$true] %s111_s7 }
  0x29   :  { %s182_s10 = scalar_lea.vmem %s112_s7, 128  ;;  %p187_p3 = scmp.lt.s32.totalorder %s112_s7, %s112_s7 }
  0x2a   :  { %p183_p2 = scmp.ne.s32.totalorder %s112_s7, %s182_s10  ;;  %p188_p4 = scmp.lt.s32.totalorder %s182_s10, %s182_s10 }
  0x2c   :  { %49 = vmax.xlane.f32.xlu0 %v48_v3  ;;  %p189_p5 = por %p188_p4, %p187_p3 }
  0x2e   :  { %p190_p6 = pnand %p189_p5, %p183_p2 }
  0x30   :  { %68 = vadd.xlane.f32.xlu0 %v67_v5 }
  0xb5   :  { %v47_v6 = vpop.xlane.xlu0 %46 }
  0xb6   :  { %v51_v7 = vsub.f32 %v40_v0, %v47_v6 }
  0xb8   :  { %v53_v8 = vmul.f32 1.442695, %v51_v7  ;;  %v88_v18 = vmul.f32 %v51_v7, %v42_v4 }
  0xb9   :  { %v50_v9 = vpop.xlane.xlu0 %49 }
  0xba   :  { %130 = vpow2.f32 %v53_v8  ;;  %v52_v10 = vsub.f32 %v41_v1, %v50_v9  ;;  %v90_v21 = vsel %vm44_vm0, %v88_v18, 0.0 }
  0xbc   :  { %v55_v11 = vmul.f32 1.442695, %v52_v10  ;;  %v89_v17 = vmul.f32 %v52_v10, %v43_v14 }
  0xbd   :  { %v69_v27 = vpop.xlane.xlu0 %68 }
  0xbe   :  { %132 = vpow2.f32 %v55_v11  ;;  %v91_v20 = vsel %vm44_vm0, %v89_v17, 0.0 }
  0xbf   :  { %v92_v22 = vadd.f32 %v91_v20, %v90_v21 }
  0xc4   :  { %v131_v12 = vpop.eup %130 }
  0xc5   :  { %v57_v13 = vsel %vm44_vm0, %v131_v12, 0.0 }
  0xc6   :  { %58 = vadd.xlane.f32.xlu1 %v57_v13 }
  0xc8   :  { %v133_v15 = vpop.eup %132 }
  0xc9   :  { %v60_v16 = vsel %vm44_vm0, %v133_v15, 0.0 }
  0xca   :  { %61 = vadd.xlane.f32.xlu1 %v60_v16 }
  0xce   :  { %71 = vadd.xlane.f32.xlu1 %v70_v19 }
  0xd2   :  { %93 = vadd.xlane.f32.xlu1 %v92_v22 }
 0x153   :  { %v59_v23 = vpop.xlane.xlu1 %58 }
 0x154   :  { %134 = vlog2.f32 %v59_v23 }
 0x157   :  { %v62_v24 = vpop.xlane.xlu1 %61 }
 0x158   :  { %136 = vlog2.f32 %v62_v24 }
 0x15b   :  { %v72_v31 = vpop.xlane.xlu1 %71 }
 0x15e   :  { %v135_v25 = vpop.eup %134 }
 0x15f   :  { %v64_v26 = vmul.f32 0.6931472, %v135_v25  ;;  %v94_v36 = vpop.xlane.xlu1 %93 }
 0x160   :  { %v95_v37 = vrot.slane %v94_v36, 4 }
 0x161   :  { %v73_v30 = vmul.f32 %v69_v27, %v64_v26 }
 0x162   :  { %v137_v28 = vpop.eup %136  ;;  %v96_v38 = vadd.f32 %v95_v37, %v94_v36 }
 0x163   :  { %v66_v29 = vmul.f32 0.6931472, %v137_v28  ;;  %v76_v33 = vsel %vm75_vm1, %v73_v30, 0.0 }
 0x164   :  { %v97_v39 = vrot.slane %v96_v38, 2 }
 0x165   :  { %v74_v32 = vmul.f32 %v72_v31, %v66_v29 }
 0x166   :  { %v98_v43 = vadd.f32 %v97_v39, %v96_v38 }
 0x167   :  { %v77_v34 = vsel %vm75_vm1, %v74_v32, 0.0 }
 0x168   :  { %v78_v35 = vadd.f32 %v77_v34, %v76_v33  ;;  %v99_v46 = vrot.slane %v98_v43, 1 }
 0x16a   :  { %79 = vadd.xlane.f32.xlu0 %v78_v35  ;;  %v100_v49 = vadd.f32 %v99_v46, %v98_v43 }
 0x1f7   :  { %v80_v40 = vpop.xlane.xlu0 %79 }
 0x1f8   :  { %v81_v41 = vrot.slane %v80_v40, 4 }
 0x1fa   :  { %v82_v42 = vadd.f32 %v81_v41, %v80_v40 }
 0x1fc   :  { %v83_v44 = vrot.slane %v82_v42, 2 }
 0x1fe   :  { %v84_v45 = vadd.f32 %v83_v44, %v82_v42 }
 0x200   :  { %v85_v47 = vrot.slane %v84_v45, 1 }
 0x202   :  { %v86_v48 = vadd.f32 %v85_v47, %v84_v45 }
 0x204   :  { %121 = vpush %v86_v48 }
 0x205   :  { %123 = vpush %v100_v49 }
 0x235   :  { %s122_s1 = spop %121 }
 0x236   :  { %s124_s8 = spop %123 }
 0x237   :  { %s102_s9 = ssub.f32 %s122_s1, %s124_s8 }
 0x239   :  { %v103_v50 = vstv %s102_s9 }
 0x23a   :  { %104 = vst [vmem:[#allocation7] sm:$0xff] %v103_v50 }
 0x23b   :  { %193 = shalt.err (!%p190_p6)
}
 0x23c   :  { %s194_s13 = scalar_lea.hbm %s276_s2, 128 }
 0x23d   :  { %p195_p7 = scmp.ne.s32.totalorder %s276_s2, %s194_s13  ;;  %p198_p8 = scmp.lt.u32.totalorder %s194_s13, %s276_s2 }
 0x23f   :  { %p200_p9 = pnand %p198_p8, %p195_p7 }
 0x241   :  { %203 = shalt.err (!%p200_p9)
}
 0x242   :  { %114 = dma.vmem_to_hbm [thread:$0]  %s112_s7, 128, %s276_s2, [#allocation4]  }
 0x243   :  { %208 = dma.done.wait [#allocation4], 128  }
 0x244   :  { %209 = vsyncadd [#allocation4], 4294967168 }
 0x245   :  { %118 = vsyncpa [#allocation3], 1 }
 0x246   :  { %119 = vsyncpa [#allocation6], 1 }
 0x247   :  { %120 = vsyncpa [#allocation4], 1 }

</bundles_post_ra>
